<compile_context>
chip_gen: v6e
topology: v6e:2x2x1
jax: 0.10.0
libtpu: 0.0.40
codegen_flags: <defaults>
</compile_context>

<pallas_src>
import functools

import jax
import jax.numpy as jnp
from jax.experimental import pallas as pl
from jax.experimental.pallas import tpu as pltpu

GAMMA = 1.0
ALPHA = 0.75
LANES = 128
MAX_BLOCK_ROWS = 4096              # 4096 x 128 x 4B = 2 MiB per input block
VMEM_LIMIT_BYTES = 48 * 1024 * 1024


def _focal_kernel(pred_ref, targ_ref, out_ref, acc_ref, *,
                  block_rows, steps_per_core, valid_rows, tail,
                  need_mask, first_masked_block):
    c = pl.program_id(0)           # core (parallel) axis
    i = pl.program_id(1)           # reduction (arbitrary) axis
    b = c * steps_per_core + i     # global (unclamped) block index

    @pl.when(i == 0)
    def _init():
        acc_ref[...] = jnp.zeros_like(acc_ref)

    x = pred_ref[...].astype(jnp.float32)
    t = targ_ref[...].astype(jnp.float32)

    # Two EUP transcendentals per element (exp, log1p); sigmoid reuses e via
    # an approx reciprocal (EUP vrcp slot) + one Newton step on the VPU.
    e = jnp.exp(-jnp.abs(x))                          # EUP #1
    sp_neg_x = jnp.maximum(-x, 0.0) + jnp.log1p(e)    # EUP #2
    log_pt = -sp_neg_x               # log(sigmoid(x)),     always finite
    log_1m_pt = -x - sp_neg_x        # log(1 - sigmoid(x)), always finite
    d = 1.0 + e
    r = pl.reciprocal(d, approx=True)
    r = r * (2.0 - d * r)            # Newton refinement (VPU)
    pt = jnp.where(x >= 0, 1.0, e) * r                # sigmoid(x)

    if GAMMA == 1.0:                 # static specialization: no pow
        focal_pos = 1.0 - pt
        focal_neg = pt
    else:                            # general path (not traced for gamma == 1)
        focal_pos = (1.0 - pt) ** GAMMA
        focal_neg = pt ** GAMMA

    loss = (-ALPHA * focal_pos * t * log_pt
            - (1.0 - ALPHA) * focal_neg * (1.0 - t) * log_1m_pt)

    def accumulate(vals):
        # Fold block rows by 8 -> (8, 128) partial; pure VPU vreg adds.
        acc_ref[...] += vals.reshape(block_rows // 8, 8, LANES).sum(axis=0)

    def masked_loss():
        row = b * block_rows + jax.lax.broadcasted_iota(
            jnp.int32, (block_rows, LANES), 0)
        valid = row < valid_rows
        if tail:
            lane = jax.lax.broadcasted_iota(jnp.int32, (block_rows, LANES), 1)
            valid = valid | ((row == valid_rows) & (lane < tail))
        return jnp.where(valid, loss, 0.0)

    if not need_mask:
        accumulate(loss)
    elif first_masked_block == 0:
        accumulate(masked_loss())
    else:
        # Steady-state blocks (fully valid) never pay for the mask.
        @pl.when(b < first_masked_block)
        def _plain():
            accumulate(loss)

        @pl.when(b >= first_masked_block)
        def _masked():
            accumulate(masked_loss())

    @pl.when(i == pl.num_programs(1) - 1)
    def _finish():
        # Lane-dense per-core partial; the tiny final reduce + divide by N
        # happens in the wrapper.
        out_ref[0, :, :] = acc_ref[...]


def bce_focal_loss(predict, target):
    assert predict.shape == target.shape
    total = predict.size

    p_flat = predict.reshape(-1)
    t_flat = target.reshape(-1)

    valid_rows = total // LANES          # number of fully valid rows
    tail = total % LANES                 # valid lanes in the partial row
    rows_raw = pl.cdiv(total, LANES)

    if rows_raw <= MAX_BLOCK_ROWS:
        # Single block: round rows up to a multiple of 8 so the folded
        # accumulator path always applies (pad is tiny here).
        block_rows = ((rows_raw + 7) // 8) * 8
        padded_rows = block_rows
    else:
        block_rows = MAX_BLOCK_ROWS
        padded_rows = rows_raw

    padded_total = padded_rows * LANES
    if padded_total != total:
        # Only pads the tail (zero-copy straight reshape in the common case).
        p_flat = jnp.pad(p_flat, (0, padded_total - total))
        t_flat = jnp.pad(t_flat, (0, padded_total - total))

    p2d = p_flat.reshape(padded_rows, LANES)
    t2d = t_flat.reshape(padded_rows, LANES)

    num_blocks = pl.cdiv(padded_rows, block_rows)
    # Leading "parallel" axis: sharded across both TensorCores on v7x; simply
    # serialized (negligible overhead) on v5e/v6e which have a single TC.
    ncores = 2 if num_blocks >= 2 else 1
    steps_per_core = pl.cdiv(num_blocks, ncores)

    if ncores * steps_per_core > num_blocks:
        last_block = num_blocks - 1

        def in_map(c, i):
            # Over-covered grid slots re-read the last block; the kernel masks
            # their contribution to zero via the (unclamped) global row index.
            return (jnp.minimum(c * steps_per_core + i, last_block), 0)
    else:
        def in_map(c, i):
            return (c * steps_per_core + i, 0)

    covered_elems = ncores * steps_per_core * block_rows * LANES
    need_mask = covered_elems != total
    first_masked_block = valid_rows // block_rows

    kernel = functools.partial(
        _focal_kernel,
        block_rows=block_rows,
        steps_per_core=steps_per_core,
        valid_rows=valid_rows,
        tail=tail,
        need_mask=need_mask,
        first_masked_block=first_masked_block,
    )

    partials = pl.pallas_call(
        kernel,
        out_shape=jax.ShapeDtypeStruct((ncores, 8, LANES), jnp.float32),
        grid_spec=pltpu.PrefetchScalarGridSpec(
            num_scalar_prefetch=0,
            grid=(ncores, steps_per_core),
            in_specs=[
                pl.BlockSpec((block_rows, LANES), in_map),
                pl.BlockSpec((block_rows, LANES), in_map),
            ],
            out_specs=pl.BlockSpec((1, 8, LANES), lambda c, i: (c, 0, 0)),
            scratch_shapes=[pltpu.VMEM((8, LANES), jnp.float32)],
        ),
        compiler_params=pltpu.CompilerParams(
            dimension_semantics=("parallel", "arbitrary"),
            vmem_limit_bytes=VMEM_LIMIT_BYTES),
    )(p2d, t2d)

    # reduction == 'mean': fold the tiny per-core (8, 128) partials in XLA.
    return jnp.sum(partials) / jnp.float32(total)


def bce_focal_loss_ref(predict, target):
    # Mirrors the PyTorch forward exactly (for moderate logits).
    x = predict.astype(jnp.float32)
    t = target.astype(jnp.float32)
    pt = jax.nn.sigmoid(x)
    loss = (-ALPHA * (1 - pt) ** GAMMA * t * jnp.log(pt)
            - (1 - ALPHA) * pt ** GAMMA * (1 - t) * jnp.log(1 - pt))
    return jnp.mean(loss)


if __name__ == "__main__":
    key = jax.random.PRNGKey(0)
    k1, k2 = jax.random.split(key)

    # Primary NCHW-shaped test, as a PyTorch conv head would produce.
    predict = jax.random.normal(k1, (2, 4, 16, 16), dtype=jnp.float32)
    target = (jax.random.uniform(k2, (2, 4, 16, 16)) > 0.5).astype(jnp.float32)

    loss = bce_focal_loss(predict, target)
    jax.block_until_ready(loss)
    ref = bce_focal_loss_ref(predict, target)
    assert jnp.allclose(loss, ref, rtol=1e-4, atol=1e-6), (loss, ref)

    # Extra coverage:
    #   (3, 5, 7, 11)     -> odd tail, single block, fully masked path
    #   (8, 8, 128, 128)  -> exactly 2 blocks, dual-core axis, no mask
    #   (2, 3, 512, 400)  -> 3 blocks, dual-core axis, over-covered grid slot
    #                        + partial boundary block (masked steady/last split)
    for idx, shp in enumerate([(3, 5, 7, 11), (8, 8, 128, 128), (2, 3, 512, 400)]):
        kk = jax.random.fold_in(key, idx + 1)
        ka, kb = jax.random.split(kk)
        p = jax.random.normal(ka, shp, dtype=jnp.float32)
        tt = (jax.random.uniform(kb, shp) > 0.5).astype(jnp.float32)
        l = bce_focal_loss(p, tt)
        jax.block_until_ready(l)
        r = bce_focal_loss_ref(p, tt)
        assert jnp.allclose(l, r, rtol=1e-4, atol=1e-6), (shp, l, r)

    print("KERNEL_OK")
</pallas_src>

<mosaic_0001>
module attributes {stable_mosaic.version = 11 : i64} {
  func.func @_focal_kernel(%arg0: i32, %arg1: i32, %arg2: memref<16x128xf32, #tpu.memory_space<vmem>>, %arg3: memref<16x128xf32, #tpu.memory_space<vmem>>, %arg4: memref<1x8x128xf32, #tpu.memory_space<vmem>>, %arg5: memref<8x128xf32, #tpu.memory_space<vmem>>) attributes {dimension_semantics = [#tpu.dimension_semantics<parallel>, #tpu.dimension_semantics<arbitrary>], iteration_bounds = array<i64: 1, 1>, scalar_prefetch = 0 : i64, scratch_operands = 1 : i64, tpu.core_type = #tpu.core_type<tc>, window_params = [{transform_indices = @transform_0, window_bounds = array<i64: 16, 128>}, {transform_indices = @transform_1, window_bounds = array<i64: 16, 128>}, {transform_indices = @transform_2, window_bounds = array<i64: 1, 8, 128>}]} {
    %c0_i32 = arith.constant 0 : i32
    %0 = arith.cmpi eq, %arg1, %c0_i32 : i32
    %1 = arith.extui %0 : i1 to i32
    %c0_i32_0 = arith.constant 0 : i32
    %2 = arith.cmpi ne, %1, %c0_i32_0 : i32
    scf.if %2 {
      %cst_23 = arith.constant 0.000000e+00 : f32
      %53 = vector.broadcast %cst_23 : f32 to vector<8x128xf32>
      %c0_24 = arith.constant 0 : index
      %c0_25 = arith.constant 0 : index
      %54 = vector.load %arg5[%c0_24, %c0_25] : memref<8x128xf32, #tpu.memory_space<vmem>>, vector<8x128xf32>
      tpu.vector_store %arg5[%c0_24, %c0_25], %53 {strides = array<i32>} : memref<8x128xf32, #tpu.memory_space<vmem>>, vector<8x128xf32>,
    } else {
    }
    %c0 = arith.constant 0 : index
    %c0_1 = arith.constant 0 : index
    %3 = vector.load %arg2[%c0, %c0_1] : memref<16x128xf32, #tpu.memory_space<vmem>>, vector<16x128xf32>
    %c0_2 = arith.constant 0 : index
    %c0_3 = arith.constant 0 : index
    %4 = vector.load %arg3[%c0_2, %c0_3] : memref<16x128xf32, #tpu.memory_space<vmem>>, vector<16x128xf32>
    %5 = math.absf %3 : vector<16x128xf32>
    %cst = arith.constant 0.000000e+00 : f32
    %6 = vector.broadcast %cst : f32 to vector<16x128xf32>
    %7 = arith.subf %6, %5 : vector<16x128xf32>
    %8 = math.exp %7 : vector<16x128xf32>
    %cst_4 = arith.constant 0.000000e+00 : f32
    %9 = vector.broadcast %cst_4 : f32 to vector<16x128xf32>
    %10 = arith.subf %9, %3 : vector<16x128xf32>
    %cst_5 = arith.constant 0.000000e+00 : f32
    %11 = vector.broadcast %cst_5 : f32 to vector<16x128xf32>
    %12 = arith.maximumf %10, %11 : vector<16x128xf32>
    %13 = math.log1p %8 : vector<16x128xf32>
    %14 = arith.addf %12, %13 : vector<16x128xf32>
    %cst_6 = arith.constant 0.000000e+00 : f32
    %15 = vector.broadcast %cst_6 : f32 to vector<16x128xf32>
    %16 = arith.subf %15, %14 : vector<16x128xf32>
    %cst_7 = arith.constant 0.000000e+00 : f32
    %17 = vector.broadcast %cst_7 : f32 to vector<16x128xf32>
    %18 = arith.subf %17, %3 : vector<16x128xf32>
    %19 = arith.subf %18, %14 : vector<16x128xf32>
    %cst_8 = arith.constant 1.000000e+00 : f32
    %20 = vector.broadcast %cst_8 : f32 to vector<16x128xf32>
    %21 = arith.addf %20, %8 : vector<16x128xf32>
    %22 = tpu.reciprocal %21 {approx = true} : vector<16x128xf32> -> vector<16x128xf32>
    %23 = arith.mulf %21, %22 : vector<16x128xf32>
    %cst_9 = arith.constant 2.000000e+00 : f32
    %24 = vector.broadcast %cst_9 : f32 to vector<16x128xf32>
    %25 = arith.subf %24, %23 : vector<16x128xf32>
    %26 = arith.mulf %22, %25 : vector<16x128xf32>
    %cst_10 = arith.constant 0.000000e+00 : f32
    %27 = vector.broadcast %cst_10 : f32 to vector<16x128xf32>
    %28 = arith.cmpf oge, %3, %27 : vector<16x128xf32>
    %cst_11 = arith.constant 1.000000e+00 : f32
    %29 = vector.broadcast %cst_11 : f32 to vector<16x128xf32>
    %30 = arith.select %28, %29, %8 : vector<16x128xi1>, vector<16x128xf32>
    %31 = arith.mulf %30, %26 : vector<16x128xf32>
    %cst_12 = arith.constant 1.000000e+00 : f32
    %32 = vector.broadcast %cst_12 : f32 to vector<16x128xf32>
    %33 = arith.subf %32, %31 : vector<16x128xf32>
    %cst_13 = arith.constant -7.500000e-01 : f32
    %34 = vector.broadcast %cst_13 : f32 to vector<16x128xf32>
    %35 = arith.mulf %34, %33 : vector<16x128xf32>
    %36 = arith.mulf %35, %4 : vector<16x128xf32>
    %37 = arith.mulf %36, %16 : vector<16x128xf32>
    %cst_14 = arith.constant 2.500000e-01 : f32
    %38 = vector.broadcast %cst_14 : f32 to vector<16x128xf32>
    %39 = arith.mulf %38, %31 : vector<16x128xf32>
    %cst_15 = arith.constant 1.000000e+00 : f32
    %40 = vector.broadcast %cst_15 : f32 to vector<16x128xf32>
    %41 = arith.subf %40, %4 : vector<16x128xf32>
    %42 = arith.mulf %39, %41 : vector<16x128xf32>
    %43 = arith.mulf %42, %19 : vector<16x128xf32>
    %44 = arith.subf %37, %43 : vector<16x128xf32>
    %c0_16 = arith.constant 0 : index
    %c0_17 = arith.constant 0 : index
    %45 = vector.load %arg5[%c0_16, %c0_17] : memref<8x128xf32, #tpu.memory_space<vmem>>, vector<8x128xf32>
    %46 = vector.shape_cast %44 : vector<16x128xf32> to vector<2x8x128xf32>
    %cst_18 = arith.constant dense<0.000000e+00> : vector<8x128xf32>
    %47 = vector.multi_reduction <add>, %46, %cst_18 [0] : vector<2x8x128xf32> to vector<8x128xf32>
    %48 = arith.addf %45, %47 : vector<8x128xf32>
    %c0_19 = arith.constant 0 : index
    %c0_20 = arith.constant 0 : index
    %49 = vector.load %arg5[%c0_19, %c0_20] : memref<8x128xf32, #tpu.memory_space<vmem>>, vector<8x128xf32>
    tpu.vector_store %arg5[%c0_19, %c0_20], %48 {strides = array<i32>} : memref<8x128xf32, #tpu.memory_space<vmem>>, vector<8x128xf32>,
    %c0_i32_21 = arith.constant 0 : i32
    %50 = arith.cmpi eq, %arg1, %c0_i32_21 : i32
    %51 = arith.extui %50 : i1 to i32
    %c0_i32_22 = arith.constant 0 : i32
    %52 = arith.cmpi ne, %51, %c0_i32_22 : i32
    scf.if %52 {
      %c0_23 = arith.constant 0 : index
      %c0_24 = arith.constant 0 : index
      %53 = vector.load %arg5[%c0_23, %c0_24] : memref<8x128xf32, #tpu.memory_space<vmem>>, vector<8x128xf32>
      %c0_25 = arith.constant 0 : index
      %c0_26 = arith.constant 0 : index
      %c0_27 = arith.constant 0 : index
      %54 = vector.load %arg4[%c0_25, %c0_26, %c0_27] : memref<1x8x128xf32, #tpu.memory_space<vmem>>, vector<1x8x128xf32>
      %55 = vector.shape_cast %54 : vector<1x8x128xf32> to vector<8x128xf32>
      %56 = vector.shape_cast %53 : vector<8x128xf32> to vector<1x8x128xf32>
      tpu.vector_store %arg4[%c0_25, %c0_26, %c0_27], %56 {strides = array<i32>} : memref<1x8x128xf32, #tpu.memory_space<vmem>>, vector<1x8x128xf32>,
    } else {
    }
    return
  }
  func.func @transform_0(%arg0: i32, %arg1: i32) -> (i32, i32) {
    %c1_i32 = arith.constant 1 : i32
    %0 = arith.muli %arg0, %c1_i32 : i32
    %1 = arith.addi %0, %arg1 : i32
    %c0_i32 = arith.constant 0 : i32
    %c0_i32_0 = arith.constant 0 : i32
    return %1, %c0_i32 : i32, i32
  }
  func.func @transform_1(%arg0: i32, %arg1: i32) -> (i32, i32) {
    %c1_i32 = arith.constant 1 : i32
    %0 = arith.muli %arg0, %c1_i32 : i32
    %1 = arith.addi %0, %arg1 : i32
    %c0_i32 = arith.constant 0 : i32
    %c0_i32_0 = arith.constant 0 : i32
    return %1, %c0_i32 : i32, i32
  }
  func.func @transform_2(%arg0: i32, %arg1: i32) -> (i32, i32, i32) {
    %c0_i32 = arith.constant 0 : i32
    %c0_i32_0 = arith.constant 0 : i32
    %c0_i32_1 = arith.constant 0 : i32
    return %arg0, %c0_i32, %c0_i32_0 : i32, i32, i32
  }
}

</mosaic_0001>

<bundles_post_ra>
// kernel: tpu_custom_call.1
= control target key start
LH: loop header
LB: loop body
LE: loop exit
PB: predicated region body
PF: predicated region fallthrough
CT: control target
= control target key end

     0   :  { %7 = vsyncpa [#allocation4], 0  ;;  %s280_s0 = inlined_call_operand.hbm [shape: f32[16,128], index: 0, kind: input, shape index: {}]   ;;  %s281_s1 = inlined_call_operand.hbm [shape: f32[16,128], index: 1, kind: input, shape index: {}]   ;;  %s282_s2 = inlined_call_operand.hbm [shape: f32[1,8,128], index: 2, kind: output, shape index: {}]  }
   0x1   :  { %8 = vsyncpa [#allocation7], 0 }
   0x2   :  { %9 = vsyncpa [#allocation5], 0  ;;  %s239_s9 = smov [#allocation3]  }
   0x3   :  { %s19_s10 = sshll.u32 %s239_s9, 4  ;;  %s20_s10 = int_to_ptr.vmem [resolvable:$true] %s19_s10 }
   0x4   :  { %s181_s11 = scalar_lea.vmem %s20_s10, 256  ;;  %p186_p1 = scmp.lt.s32.totalorder %s20_s10, %s20_s10 }
   0x5   :  { %p182_p0 = scmp.ne.s32.totalorder %s20_s10, %s181_s11  ;;  %p187_p2 = scmp.lt.s32.totalorder %s181_s11, %s181_s11 }
   0x7   :  { %p188_p3 = por %p187_p2, %p186_p1 }
   0x9   :  { %p189_p4 = pnand %p188_p3, %p182_p0 }
   0xb   :  { %192 = shalt.err (!%p189_p4)
}
   0xc   :  { %s240_s12 = smov 128   ;;  %s241_s13 = smov 8  }
   0xd   :  { %25 = dma.hbm_to_vmem [thread:$0]  %s280_s0, 256, %s20_s10, [#allocation4], %s240_s12, %s240_s12, %s241_s13  }
   0xe   :  { %s242_s16 = smov [#allocation6]  }
   0xf   :  { %s35_s17 = sshll.u32 %s242_s16, 4  ;;  %s36_s17 = int_to_ptr.vmem [resolvable:$true] %s35_s17 }
  0x10   :  { %s201_s18 = scalar_lea.vmem %s36_s17, 256  ;;  %p206_p6 = scmp.lt.s32.totalorder %s36_s17, %s36_s17 }
  0x11   :  { %p202_p5 = scmp.ne.s32.totalorder %s36_s17, %s201_s18  ;;  %p207_p7 = scmp.lt.s32.totalorder %s201_s18, %s201_s18 }
  0x13   :  { %p208_p8 = por %p207_p7, %p206_p6 }
  0x15   :  { %p209_p9 = pnand %p208_p8, %p202_p5 }
  0x17   :  { %212 = shalt.err (!%p209_p9)
}
  0x18   :  { %41 = dma.hbm_to_vmem [thread:$0]  %s281_s1, 256, %s36_s17, [#allocation7], %s240_s12, %s240_s12, %s241_s13  }
  0x19   :  { %233 = dma.done.wait [#allocation4], 256  }
  0x1a   :  { %234 = vsyncadd [#allocation4], 4294967040 }
  0x1b   :  { %235 = dma.done.wait [#allocation7], 256  }
  0x1c   :  { %236 = vsyncadd [#allocation7], 4294967040  ;;  %v57_v0 = vld [vmem:[#allocation3] sm:$0xff]  ;;  %v58_v1 = vld [vmem:[#allocation3 + $0x8] sm:$0xff]  ;;  %s243_s0 = smov [#allocation8]  }
  0x1d   :  { %v61_v2 = vand.u32 2147483647, %v57_v0  ;;  %v62_v3 = vand.u32 2147483647, %v58_v1  ;;  %v69_v18 = vsub.f32 0.0, %v57_v0  ;;  %v70_v20 = vsub.f32 0.0, %v58_v1 }
  0x1e   :  { %vm107_vm2 = vcmp.ge.f32.partialorder %v57_v0, 0.0  ;;  %vm108_vm3 = vcmp.ge.f32.partialorder %v58_v1, 0.0  ;;  %v59_v37 = vld [vmem:[#allocation6] sm:$0xff]  ;;  %v60_v40 = vld [vmem:[#allocation6 + $0x8] sm:$0xff]  ;;  %s146_s1 = sshll.u32 %s243_s0, 4  ;;  %s147_s1 = int_to_ptr.vmem [resolvable:$true] %s146_s1 }
  0x1f   :  { %v63_v4 = vsub.f32 0.0, %v61_v2  ;;  %v64_v5 = vsub.f32 0.0, %v62_v3  ;;  %v71_v30 = vmax.f32 %v69_v18, 0.0  ;;  %v72_v32 = vmax.f32 %v70_v20, 0.0  ;;  %s213_s21 = scalar_lea.vmem %s147_s1, 128  ;;  %p218_p11 = scmp.lt.s32.totalorder %s147_s1, %s147_s1 }
  0x20   :  { %v123_v47 = vsub.f32 1.0, %v59_v37  ;;  %v124_v49 = vsub.f32 1.0, %v60_v40  ;;  %p214_p10 = scmp.ne.s32.totalorder %s147_s1, %s213_s21  ;;  %p219_p12 = scmp.lt.s32.totalorder %s213_s21, %s213_s21 }
  0x21   :  { %v65_v6 = vmul.f32 1.442695, %v63_v4  ;;  %v67_v7 = vmul.f32 1.442695, %v64_v5 }
  0x22   :  { %p220_p13 = por %p219_p12, %p218_p11 }
  0x23   :  { %161 = vpow2.f32 %v65_v6 }
  0x24   :  { %163 = vpow2.f32 %v67_v7  ;;  %p221_p0 = pnand %p220_p13, %p214_p10 }
  0x30   :  { %v162_v8 = vpop.eup %161 }
  0x31   :  { %v164_v9 = vpop.eup %163  ;;  %v73_v10 = vadd.f32 1.0, %v162_v8  ;;  %v76_v12 = vmul.f32 -0.5, %v162_v8  ;;  %v79_v15 = vand.u32 2147483647, %v162_v8  ;;  %v109_v39 = vsel %vm107_vm2, 1.0, %v162_v8 }
  0x32   :  { %v82_v11 = vadd.f32 1.0, %v164_v9  ;;  %v85_v13 = vmul.f32 -0.5, %v164_v9  ;;  %v88_v17 = vand.u32 2147483647, %v164_v9  ;;  %v110_v43 = vsel %vm108_vm3, 1.0, %v164_v9 }
  0x33   :  { %165 = vlog2.f32 %v73_v10  ;;  %v77_v14 = vadd.f32 1.0, %v76_v12  ;;  %vm265_vm0 = vcmp.lt.f32.partialorder %v79_v15, 0.0004427343 }
  0x34   :  { %167 = vlog2.f32 %v82_v11  ;;  %v86_v16 = vadd.f32 1.0, %v85_v13  ;;  %vm269_vm1 = vcmp.lt.f32.partialorder %v88_v17, 0.0004427343 }
  0x35   :  { %169 = vrcp.f32 %v73_v10  ;;  %v78_v21 = vmul.f32 %v162_v8, %v77_v14 }
  0x36   :  { %171 = vrcp.f32 %v82_v11  ;;  %v87_v25 = vmul.f32 %v164_v9, %v86_v16 }
  0x40   :  { %v166_v19 = vpop.eup %165 }
  0x41   :  { %v168_v22 = vpop.eup %167  ;;  %v75_v23 = vmul.f32 0.6931472, %v166_v19 }
  0x42   :  { %v170_v26 = vpop.eup %169  ;;  %v84_v27 = vmul.f32 0.6931472, %v168_v22 }
  0x43   :  { %v172_v29 = vpop.eup %171  ;;  %v101_v31 = vmul.f32 %v170_v26, %v73_v10  ;;  %v81_v33 = vsel %vm265_vm0, %v78_v21, %v75_v23 }
  0x44   :  { %v102_v34 = vmul.f32 %v172_v29, %v82_v11  ;;  %v90_v35 = vsel %vm269_vm1, %v87_v25, %v84_v27  ;;  %v91_v41 = vadd.f32 %v81_v33, %v71_v30 }
  0x45   :  { %v103_v36 = vsub.f32 2.0, %v101_v31  ;;  %v92_v44 = vadd.f32 %v90_v35, %v72_v32 }
  0x46   :  { %v104_v38 = vsub.f32 2.0, %v102_v34  ;;  %v95_v50 = vsub.f32 %v69_v18, %v91_v41  ;;  %v93_v56 = vsub.f32 0.0, %v91_v41 }
  0x47   :  { %v105_v42 = vmul.f32 %v170_v26, %v103_v36  ;;  %v96_v53 = vsub.f32 %v70_v20, %v92_v44  ;;  %v94_v59 = vsub.f32 0.0, %v92_v44 }
  0x48   :  { %v106_v45 = vmul.f32 %v172_v29, %v104_v38 }
  0x49   :  { %v111_v46 = vmul.f32 %v109_v39, %v105_v42 }
  0x4a   :  { %v112_v48 = vmul.f32 %v110_v43, %v106_v45 }
  0x4b   :  { %v113_v51 = vsub.f32 1.0, %v111_v46  ;;  %v121_v52 = vmul.f32 0.25, %v111_v46 }
  0x4c   :  { %v114_v54 = vsub.f32 1.0, %v112_v48  ;;  %v122_v55 = vmul.f32 0.25, %v112_v48 }
  0x4d   :  { %v115_v57 = vmul.f32 -0.75, %v113_v51  ;;  %v125_v58 = vmul.f32 %v123_v47, %v121_v52 }
  0x4e   :  { %v116_v60 = vmul.f32 -0.75, %v114_v54  ;;  %v126_v61 = vmul.f32 %v124_v49, %v122_v55 }
  0x4f   :  { %v117_v62 = vmul.f32 %v115_v57, %v59_v37  ;;  %v127_v63 = vmul.f32 %v125_v58, %v95_v50 }
  0x50   :  { %v118_v0 = vmul.f32 %v116_v60, %v60_v40  ;;  %v128_v1 = vmul.f32 %v126_v61, %v96_v53 }
  0x51   :  { %v119_v2 = vmul.f32 %v117_v62, %v93_v56 }
  0x52   :  { %v120_v3 = vmul.f32 %v118_v0, %v94_v59 }
  0x53   :  { %v129_v4 = vsub.f32 %v119_v2, %v127_v63 }
  0x54   :  { %v130_v5 = vsub.f32 %v120_v3, %v128_v1 }
  0x56   :  { %v132_v6 = vadd.f32 %v130_v5, %v129_v4 }
  0x58   :  { %139 = vst [vmem:[#allocation8] sm:$0xff] %v132_v6 }
  0x59   :  { %224 = shalt.err (!%p221_p0)
}
  0x5a   :  { %149 = dma.vmem_to_hbm [thread:$0]  %s147_s1, 128, %s282_s2, [#allocation5]  }
  0x5b   :  { %237 = dma.done.wait [#allocation5], 128  }
  0x5c   :  { %238 = vsyncadd [#allocation5], 4294967168 }
  0x5d   :  { %153 = vsyncpa [#allocation4], 1 }
  0x5e   :  { %154 = vsyncpa [#allocation7], 1 }
  0x5f   :  { %155 = vsyncpa [#allocation5], 1 }

</bundles_post_ra>
